<compile_context>
chip_gen: v7x
topology: tpu7x:2x2x1
jax: 0.10.0
libtpu: 0.0.40
codegen_flags: <defaults>
</compile_context>

<pallas_src>
import functools

import jax
import jax.numpy as jnp
from jax.experimental import pallas as pl
from jax.experimental.pallas import tpu as pltpu

BN_EPS = 1e-5
OUT_PAD = 128  # lane-dense output slab width


def _round_up(x, m):
    return (x + m - 1) // m * m


def _tmodel_kernel(
    x_ref, w1_ref, b1_ref, w2_ref, b2_ref,
    probs_ref, logits_ref,
    *, num_classes: int, out_dim: int,
):
    # ---- fc1 + relu (MXU) ---------------------------------------------------
    h = jnp.dot(x_ref[...], w1_ref[...], preferred_element_type=jnp.float32)
    h = jnp.maximum(h + b1_ref[...], 0.0)

    # ---- fc2 (MXU) — W2/b2 are zero-padded to OUT_PAD lanes -----------------
    logits = jnp.dot(h, w2_ref[...], preferred_element_type=jnp.float32) + b2_ref[...]
    logits_ref[...] = logits.astype(logits_ref.dtype)          # lane-dense store

    # ---- output head (only the first out_dim columns are "real") ------------
    col = jax.lax.broadcasted_iota(jnp.int32, logits.shape, 1)
    valid = col < out_dim
    if num_classes == 2:
        probs = 1.0 / (1.0 + jnp.exp(-logits))                  # sigmoid
    else:
        masked = jnp.where(valid, logits, -jnp.inf)
        m = jnp.max(masked, axis=1, keepdims=True)
        e = jnp.where(valid, jnp.exp(masked - m), 0.0)
        denom = jnp.sum(e, axis=1, keepdims=True)
        probs = e / denom                                       # exact (row sums == 1)
    probs_ref[...] = probs.astype(probs_ref.dtype)              # lane-dense store


def tmodel_forward(
    s_concepts_pred, us_concepts_pred, ex_feat, params,
    *, num_classes: int, norm_bottleneck: bool, fusion: bool, block_b: int = 512,
):
    """Fold BN + concats into fc1 outside the kernel, then run a batch-tiled
    dot->relu->dot->head Pallas kernel with resident weights and 128-lane
    output slabs."""
    B = s_concepts_pred.shape[0]
    C = s_concepts_pred.shape[1] + us_concepts_pred.shape[1]
    out_dim = 1 if num_classes == 2 else num_classes

    # ---- fold eval-mode BatchNorm into fc1 (free algebra, done once) --------
    w1 = params["w1"]                       # (in_dim, hidden)
    b1 = params["b1"]                       # (1, hidden)
    if norm_bottleneck:
        scale = params["bn_gamma"] * jax.lax.rsqrt(params["bn_var"] + BN_EPS)  # (1, C)
        shift = params["bn_beta"] - params["bn_mean"] * scale                   # (1, C)
        w1_c = w1[:C] * scale.reshape(C, 1)
        w1 = jnp.concatenate([w1_c, w1[C:]], axis=0) if w1.shape[0] > C else w1_c
        b1 = b1 + shift @ params["w1"][:C]

    # ---- pre-concatenate features (no lane-axis concat inside the kernel) ---
    feats = [s_concepts_pred, us_concepts_pred] + ([ex_feat] if fusion else [])
    x = jnp.concatenate(feats, axis=1).astype(jnp.float32)
    in_dim = x.shape[1]
    assert in_dim == w1.shape[0], "fc1 in_features mismatch (fusion/num_ex_feat)"
    hidden = w1.shape[1]

    # ---- zero-pad fc2 to a lane-dense 128-wide output slab -------------------
    w2p = jnp.zeros((hidden, OUT_PAD), jnp.float32).at[:, :out_dim].set(params["w2"])
    b2p = jnp.zeros((1, OUT_PAD), jnp.float32).at[:, :out_dim].set(params["b2"])

    # ---- batch tiling ---------------------------------------------------------
    TB = min(block_b, _round_up(B, 8))
    Bp = _round_up(B, TB)
    if Bp != B:
        x = jnp.pad(x, ((0, Bp - B), (0, 0)))
    grid = (Bp // TB,)

    kernel = functools.partial(
        _tmodel_kernel, num_classes=num_classes, out_dim=out_dim)

    cost = pl.CostEstimate(
        flops=2 * Bp * (in_dim * hidden + hidden * OUT_PAD),
        transcendentals=Bp * OUT_PAD,
        bytes_accessed=4 * (Bp * in_dim + in_dim * hidden + hidden * OUT_PAD
                            + 2 * Bp * OUT_PAD),
    )

    probs_p, logits_p = pl.pallas_call(
        kernel,
        out_shape=(
            jax.ShapeDtypeStruct((Bp, OUT_PAD), jnp.float32),
            jax.ShapeDtypeStruct((Bp, OUT_PAD), jnp.float32),
        ),
        grid=grid,
        in_specs=[
            pl.BlockSpec((TB, in_dim), lambda i: (i, 0)),        # x: batch-tiled
            pl.BlockSpec((in_dim, hidden), lambda i: (0, 0)),    # W1: resident
            pl.BlockSpec((1, hidden), lambda i: (0, 0)),         # b1: resident
            pl.BlockSpec((hidden, OUT_PAD), lambda i: (0, 0)),   # W2: resident
            pl.BlockSpec((1, OUT_PAD), lambda i: (0, 0)),        # b2: resident
        ],
        out_specs=(
            pl.BlockSpec((TB, OUT_PAD), lambda i: (i, 0)),
            pl.BlockSpec((TB, OUT_PAD), lambda i: (i, 0)),
        ),
        compiler_params=pltpu.CompilerParams(
            dimension_semantics=("parallel",),
            vmem_limit_bytes=32 * 1024 * 1024,
        ),
        cost_estimate=cost,
    )(x, w1, b1, w2p, b2p)

    # strip batch padding and lane padding
    return probs_p[:B, :out_dim], logits_p[:B, :out_dim]


def _reference(s, us, ex, params, *, num_classes, norm_bottleneck, fusion):
    """Pure-JAX reference mirroring the PyTorch forward (eval-mode BN)."""
    c = jnp.concatenate([s, us], axis=1)
    if norm_bottleneck:
        inv = jax.lax.rsqrt(params["bn_var"] + BN_EPS)
        c = (c - params["bn_mean"]) * inv * params["bn_gamma"] + params["bn_beta"]
    x = jnp.concatenate([c, ex], axis=1) if fusion else c
    h = jnp.maximum(x @ params["w1"] + params["b1"], 0.0)
    logits = h @ params["w2"] + params["b2"]
    if num_classes == 2:
        probs = jax.nn.sigmoid(logits)
    else:
        probs = jax.nn.softmax(logits, axis=1)
    return probs, logits


def init_params(key, num_s, num_us, num_ex, hidden, num_classes):
    """Deterministic synthetic parameter init (shapes match the PyTorch module)."""
    c = num_s + num_us
    in_dim = c + num_ex
    out_dim = 1 if num_classes == 2 else num_classes
    k1, k2, k3, k4, k5, k6 = jax.random.split(key, 6)
    return {
        # BatchNorm1d(num_s + num_us): affine + running stats (eval mode)
        "bn_gamma": jax.random.uniform(k1, (1, c), jnp.float32, 0.5, 1.5),
        "bn_beta": jax.random.normal(k2, (1, c), jnp.float32) * 0.1,
        "bn_mean": jax.random.normal(k3, (1, c), jnp.float32) * 0.1,
        "bn_var": jax.random.uniform(k4, (1, c), jnp.float32, 0.5, 1.5),
        # Linear(in_dim, hidden) — stored transposed: (in, out)
        "w1": jax.random.normal(k5, (in_dim, hidden), jnp.float32)
        * (1.0 / jnp.sqrt(in_dim)),
        "b1": jnp.zeros((1, hidden), jnp.float32),
        # Linear(hidden, out_dim) — stored transposed
        "w2": jax.random.normal(k6, (hidden, out_dim), jnp.float32)
        * (1.0 / jnp.sqrt(hidden)),
        "b2": jnp.zeros((1, out_dim), jnp.float32),
    }


if __name__ == "__main__":
    # small config consistent with the module's __init__
    NUM_CLASSES = 3
    NUM_S, NUM_US, NUM_EX = 4, 4, 4
    HIDDEN = 32
    NORM_BOTTLENECK = True
    FUSION = True
    BATCH = 8

    key = jax.random.PRNGKey(0)
    kp, ks, ku, ke = jax.random.split(key, 4)

    params = init_params(kp, NUM_S, NUM_US, NUM_EX, HIDDEN, NUM_CLASSES)
    s_pred = jax.random.normal(ks, (BATCH, NUM_S), jnp.float32)
    us_pred = jax.random.normal(ku, (BATCH, NUM_US), jnp.float32)
    ex_feat = jax.random.normal(ke, (BATCH, NUM_EX), jnp.float32)

    probs, logits = tmodel_forward(
        s_pred, us_pred, ex_feat, params,
        num_classes=NUM_CLASSES,
        norm_bottleneck=NORM_BOTTLENECK,
        fusion=FUSION,
    )
    jax.block_until_ready((probs, logits))

    # sanity: shapes, softmax rows sum to 1, and match pure-JAX reference
    assert probs.shape == (BATCH, NUM_CLASSES)
    assert logits.shape == (BATCH, NUM_CLASSES)
    assert bool(jnp.allclose(jnp.sum(probs, axis=1), 1.0, atol=1e-5))

    ref_probs, ref_logits = _reference(
        s_pred, us_pred, ex_feat, params,
        num_classes=NUM_CLASSES, norm_bottleneck=NORM_BOTTLENECK, fusion=FUSION)
    assert bool(jnp.allclose(logits, ref_logits, atol=1e-4, rtol=1e-4))
    assert bool(jnp.allclose(probs, ref_probs, atol=1e-5, rtol=1e-4))

    print("KERNEL_OK")
</pallas_src>

<mosaic_0001>
module attributes {stable_mosaic.version = 11 : i64} {
  func.func @_tmodel_kernel(%arg0: i32, %arg1: memref<8x12xf32, #tpu.memory_space<vmem>>, %arg2: memref<12x32xf32, #tpu.memory_space<vmem>>, %arg3: memref<1x32xf32, #tpu.memory_space<vmem>>, %arg4: memref<32x128xf32, #tpu.memory_space<vmem>>, %arg5: memref<1x128xf32, #tpu.memory_space<vmem>>, %arg6: memref<8x128xf32, #tpu.memory_space<vmem>>, %arg7: memref<8x128xf32, #tpu.memory_space<vmem>>) attributes {dimension_semantics = [#tpu.dimension_semantics<parallel>], iteration_bounds = array<i64: 1>, scalar_prefetch = 0 : i64, scratch_operands = 0 : i64, tpu.core_type = #tpu.core_type<tc>, window_params = [{transform_indices = @transform_0, window_bounds = array<i64: 8, 12>}, {pipeline_mode = #tpu.pipeline_mode<synchronous>, transform_indices = @transform_1, window_bounds = array<i64: 12, 32>}, {pipeline_mode = #tpu.pipeline_mode<synchronous>, transform_indices = @transform_2, window_bounds = array<i64: 1, 32>}, {pipeline_mode = #tpu.pipeline_mode<synchronous>, transform_indices = @transform_3, window_bounds = array<i64: 32, 128>}, {pipeline_mode = #tpu.pipeline_mode<synchronous>, transform_indices = @transform_4, window_bounds = array<i64: 1, 128>}, {transform_indices = @transform_5, window_bounds = array<i64: 8, 128>}, {transform_indices = @transform_6, window_bounds = array<i64: 8, 128>}]} {
    %c0 = arith.constant 0 : index
    %c0_0 = arith.constant 0 : index
    %0 = vector.load %arg1[%c0, %c0_0] : memref<8x12xf32, #tpu.memory_space<vmem>>, vector<8x12xf32>
    %c0_1 = arith.constant 0 : index
    %c0_2 = arith.constant 0 : index
    %1 = vector.load %arg2[%c0_1, %c0_2] : memref<12x32xf32, #tpu.memory_space<vmem>>, vector<12x32xf32>
    %cst = arith.constant dense<0.000000e+00> : vector<8x32xf32>
    %2 = tpu.matmul %0, %1, %cst {dimension_numbers = #tpu.dot_dimension_numbers<[1], [0], [0], [1], [0, 0, 1, 1], [], []>} : vector<8x12xf32>, vector<12x32xf32>, vector<8x32xf32> -> vector<8x32xf32>
    %c0_3 = arith.constant 0 : index
    %c0_4 = arith.constant 0 : index
    %3 = vector.load %arg3[%c0_3, %c0_4] : memref<1x32xf32, #tpu.memory_space<vmem>>, vector<1x32xf32>
    %4 = vector.broadcast %3 : vector<1x32xf32> to vector<8x32xf32>
    %5 = arith.addf %2, %4 : vector<8x32xf32>
    %cst_5 = arith.constant 0.000000e+00 : f32
    %6 = vector.broadcast %cst_5 : f32 to vector<8x32xf32>
    %7 = arith.maximumf %5, %6 : vector<8x32xf32>
    %c0_6 = arith.constant 0 : index
    %c0_7 = arith.constant 0 : index
    %8 = vector.load %arg4[%c0_6, %c0_7] : memref<32x128xf32, #tpu.memory_space<vmem>>, vector<32x128xf32>
    %cst_8 = arith.constant dense<0.000000e+00> : vector<8x128xf32>
    %9 = tpu.matmul %7, %8, %cst_8 {dimension_numbers = #tpu.dot_dimension_numbers<[1], [0], [0], [1], [0, 0, 1, 1], [], []>} : vector<8x32xf32>, vector<32x128xf32>, vector<8x128xf32> -> vector<8x128xf32>
    %c0_9 = arith.constant 0 : index
    %c0_10 = arith.constant 0 : index
    %10 = vector.load %arg5[%c0_9, %c0_10] : memref<1x128xf32, #tpu.memory_space<vmem>>, vector<1x128xf32>
    %11 = vector.broadcast %10 : vector<1x128xf32> to vector<8x128xf32>
    %12 = arith.addf %9, %11 : vector<8x128xf32>
    %c0_11 = arith.constant 0 : index
    %c0_12 = arith.constant 0 : index
    %13 = vector.load %arg7[%c0_11, %c0_12] : memref<8x128xf32, #tpu.memory_space<vmem>>, vector<8x128xf32>
    tpu.vector_store %arg7[%c0_11, %c0_12], %12 {strides = array<i32>} : memref<8x128xf32, #tpu.memory_space<vmem>>, vector<8x128xf32>,
    %14 = tpu.iota {dimensions = array<i32: 1>} : vector<8x128xi32>
    %c3_i32 = arith.constant 3 : i32
    %15 = vector.broadcast %c3_i32 : i32 to vector<8x128xi32>
    %16 = arith.cmpi slt, %14, %15 : vector<8x128xi32>
    %cst_13 = arith.constant 0xFF800000 : f32
    %17 = vector.broadcast %cst_13 : f32 to vector<8x128xf32>
    %18 = arith.select %16, %12, %17 : vector<8x128xi1>, vector<8x128xf32>
    %cst_14 = arith.constant dense<0xFF800000> : vector<8xf32>
    %19 = vector.multi_reduction <maximumf>, %18, %cst_14 [1] : vector<8x128xf32> to vector<8xf32>
    %20 = vector.shape_cast %19 : vector<8xf32> to vector<8x1xf32>
    %21 = vector.broadcast %20 : vector<8x1xf32> to vector<8x128xf32>
    %22 = arith.subf %18, %21 : vector<8x128xf32>
    %23 = math.exp %22 : vector<8x128xf32>
    %cst_15 = arith.constant 0.000000e+00 : f32
    %24 = vector.broadcast %cst_15 : f32 to vector<8x128xf32>
    %25 = arith.select %16, %23, %24 : vector<8x128xi1>, vector<8x128xf32>
    %cst_16 = arith.constant dense<0.000000e+00> : vector<8xf32>
    %26 = vector.multi_reduction <add>, %25, %cst_16 [1] : vector<8x128xf32> to vector<8xf32>
    %27 = vector.shape_cast %26 : vector<8xf32> to vector<8x1xf32>
    %28 = vector.broadcast %27 : vector<8x1xf32> to vector<8x128xf32>
    %29 = arith.divf %25, %28 : vector<8x128xf32>
    %c0_17 = arith.constant 0 : index
    %c0_18 = arith.constant 0 : index
    %30 = vector.load %arg6[%c0_17, %c0_18] : memref<8x128xf32, #tpu.memory_space<vmem>>, vector<8x128xf32>
    tpu.vector_store %arg6[%c0_17, %c0_18], %29 {strides = array<i32>} : memref<8x128xf32, #tpu.memory_space<vmem>>, vector<8x128xf32>,
    return
  }
  func.func @transform_0(%arg0: i32) -> (i32, i32) {
    %c0_i32 = arith.constant 0 : i32
    %c0_i32_0 = arith.constant 0 : i32
    return %arg0, %c0_i32 : i32, i32
  }
  func.func @transform_1(%arg0: i32) -> (i32, i32) {
    %c0_i32 = arith.constant 0 : i32
    %c0_i32_0 = arith.constant 0 : i32
    %c0_i32_1 = arith.constant 0 : i32
    return %c0_i32, %c0_i32_0 : i32, i32
  }
  func.func @transform_2(%arg0: i32) -> (i32, i32) {
    %c0_i32 = arith.constant 0 : i32
    %c0_i32_0 = arith.constant 0 : i32
    %c0_i32_1 = arith.constant 0 : i32
    return %c0_i32, %c0_i32_0 : i32, i32
  }
  func.func @transform_3(%arg0: i32) -> (i32, i32) {
    %c0_i32 = arith.constant 0 : i32
    %c0_i32_0 = arith.constant 0 : i32
    %c0_i32_1 = arith.constant 0 : i32
    return %c0_i32, %c0_i32_0 : i32, i32
  }
  func.func @transform_4(%arg0: i32) -> (i32, i32) {
    %c0_i32 = arith.constant 0 : i32
    %c0_i32_0 = arith.constant 0 : i32
    %c0_i32_1 = arith.constant 0 : i32
    return %c0_i32, %c0_i32_0 : i32, i32
  }
  func.func @transform_5(%arg0: i32) -> (i32, i32) {
    %c0_i32 = arith.constant 0 : i32
    %c0_i32_0 = arith.constant 0 : i32
    return %arg0, %c0_i32 : i32, i32
  }
  func.func @transform_6(%arg0: i32) -> (i32, i32) {
    %c0_i32 = arith.constant 0 : i32
    %c0_i32_0 = arith.constant 0 : i32
    return %arg0, %c0_i32 : i32, i32
  }
}

</mosaic_0001>

<bundles_post_ra>
// kernel: tpu_custom_call.1
= control target key start
LH: loop header
LB: loop body
LE: loop exit
PB: predicated region body
PF: predicated region fallthrough
CT: control target
= control target key end

     0   :  { %12 = vsyncpa [#allocation3], 0  ;;  %s575_s0 = inlined_call_operand.hbm [shape: f32[8,12], index: 0, kind: input, shape index: {}]   ;;  %s576_s1 = inlined_call_operand.hbm [shape: f32[12,32], index: 1, kind: input, shape index: {}]   ;;  %s577_s2 = inlined_call_operand.vmem [shape: f32[1,32], index: 2, kind: input, shape index: {}]   ;;  %s578_s3 = inlined_call_operand.hbm [shape: f32[32,128], index: 3, kind: input, shape index: {}]   ;;  %s579_s4 = inlined_call_operand.vmem [shape: f32[1,128], index: 4, kind: input, shape index: {}]   ;;  %s580_s5 = inlined_call_operand.hbm [shape: f32[8,128], index: 5, kind: output, shape index: {0}]   ;;  %s581_s6 = inlined_call_operand.hbm [shape: f32[8,128], index: 6, kind: output, shape index: {1}]  }
   0x1   :  { %13 = vsyncpa [#allocation6], 0 }
   0x2   :  { %14 = vsyncpa [#allocation4], 0 }
   0x3   :  { %15 = vsyncpa [#allocation10], 0  ;;  %s457_s21 = smov [#allocation5]   ;;  %s339_s25 = scalar_lea.hbm %s576_s1, 256 }
   0x4   :  { %s31_s22 = sshll.u32 %s457_s21, 4  ;;  %p340_p0 = scmp.ne.s32.totalorder %s576_s1, %s339_s25  ;;  %s32_s22 = int_to_ptr.vmem [resolvable:$true] %s31_s22 }
   0x5   :  { %p343_p1 = scmp.lt.u32.totalorder %s339_s25, %s576_s1 }
   0x7   :  { %p345_p2 = pnand %p343_p1, %p340_p0 }
   0x9   :  { %348 = shalt.err (!%p345_p2)
}
   0xa   :  { %s349_s30 = scalar_lea.vmem %s32_s22, 256  ;;  %p354_p4 = scmp.lt.s32.totalorder %s32_s22, %s32_s22 }
   0xb   :  { %p350_p3 = scmp.ne.s32.totalorder %s32_s22, %s349_s30  ;;  %p355_p5 = scmp.lt.s32.totalorder %s349_s30, %s349_s30 }
   0xd   :  { %p356_p6 = por %p355_p5, %p354_p4 }
   0xf   :  { %p357_p7 = pnand %p356_p6, %p350_p3 }
  0x11   :  { %360 = shalt.err (!%p357_p7)
}
  0x12   :  { %s458_s7 = smov 128   ;;  %s459_s8 = smov 8  }
  0x13   :  { %37 = dma.hbm_to_vmem [thread:$0]  %s576_s1, 256, %s32_s22, [#allocation6], %s458_s7, %s458_s7, %s459_s8  }
  0x14   :  { %s460_s11 = smov [#allocation2]   ;;  %s461_s13 = smov [#allocation7]  }
  0x15   :  { %s22_s12 = sshll.u32 %s460_s11, 4  ;;  %s45_s14 = sshll.u32 %s461_s13, 4  ;;  %s23_s12 = int_to_ptr.vmem [resolvable:$true] %s22_s12  ;;  %s46_s14 = int_to_ptr.vmem [resolvable:$true] %s45_s14 }
  0x16   :  { %s361_s17 = scalar_lea.hbm %s575_s0, 128 }
  0x17   :  { %p362_p8 = scmp.ne.s32.totalorder %s575_s0, %s361_s17  ;;  %p365_p9 = scmp.lt.u32.totalorder %s361_s17, %s575_s0 }
  0x19   :  { %p367_p10 = pnand %p365_p9, %p362_p8 }
  0x1b   :  { %370 = shalt.err (!%p367_p10)
}
  0x1c   :  { %s371_s1 = scalar_lea.vmem %s23_s12, 128  ;;  %p376_p12 = scmp.lt.s32.totalorder %s23_s12, %s23_s12 }
  0x1d   :  { %p372_p11 = scmp.ne.s32.totalorder %s23_s12, %s371_s1  ;;  %p377_p13 = scmp.lt.s32.totalorder %s371_s1, %s371_s1 }
  0x1f   :  { %p378_p0 = por %p377_p13, %p376_p12 }
  0x21   :  { %p379_p1 = pnand %p378_p0, %p372_p11 }
  0x23   :  { %382 = shalt.err (!%p379_p1)
}
  0x24   :  { %25 = dma.hbm_to_vmem [thread:$0]  %s575_s0, 128, %s23_s12, [#allocation3]  }
  0x25   :  { %s383_s26 = scalar_lea.hbm %s578_s3, 512 }
  0x26   :  { %p384_p2 = scmp.ne.s32.totalorder %s578_s3, %s383_s26  ;;  %p387_p3 = scmp.lt.u32.totalorder %s383_s26, %s578_s3 }
  0x28   :  { %p389_p4 = pnand %p387_p3, %p384_p2 }
  0x2a   :  { %392 = shalt.err (!%p389_p4)
}
  0x2b   :  { %s393_s9 = scalar_lea.vmem %s46_s14, 512  ;;  %p398_p6 = scmp.lt.s32.totalorder %s46_s14, %s46_s14 }
  0x2c   :  { %p394_p5 = scmp.ne.s32.totalorder %s46_s14, %s393_s9  ;;  %p399_p7 = scmp.lt.s32.totalorder %s393_s9, %s393_s9 }
  0x2e   :  { %p400_p8 = por %p399_p7, %p398_p6 }
  0x30   :  { %p401_p9 = pnand %p400_p8, %p394_p5 }
  0x32   :  { %404 = shalt.err (!%p401_p9)
}
  0x33   :  { %51 = dma.hbm_to_vmem [thread:$0]  %s578_s3, 512, %s46_s14, [#allocation6], %s458_s7, %s458_s7, %s459_s8  }
  0x34   :  { %449 = dma.done.wait [#allocation3], 128  }
  0x35   :  { %450 = vsyncadd [#allocation3], 4294967168 }
  0x36   :  { %451 = dma.done.wait [#allocation6], 768  }
  0x37   :  { %452 = vsyncadd [#allocation6], 4294966528  ;;  %v462_v0 = vmov 0.0|0.0   ;;  %vm463_vm0 = vmmov 0   ;;  %v464_v1 = vmov 0.0   ;;  %vm77_vm1 = vcmask 1043456  }
  0x38   :  { %314 = vmatprep.subr.bf16.mxu0 %v462_v0  ;;  %318 = vmatprep.subr.bf16.mxu1 %v462_v0  ;;  %v64_v2 = vld [vmem:[#allocation5] sm:$0xff]  ;;  %v65_v3 = vld [vmem:[#allocation5 + $0x8] sm:$0xf]  ;;  %vm465_vm2 = vmmov 1   ;;  %v152_v5 = vld [vmem:[#allocation7] sm:$0xff]  ;;  %vm73_vm4 = vcmask 97280   ;;  %v238_v17 = vlaneseq }
  0x39   :  { %300 = vmatprep.mubr.msk.f32.mxu0 %vm463_vm0, %v464_v1  ;;  %311 = vmatprep.mubr.msk.f32.mxu1 %vm463_vm0, %v464_v1  ;;  %vm316_vm3 = vmpackc.low %vm77_vm1, %vm465_vm2  ;;  %v315_v4 = vpack.c.bf16 %v65_v3, %v64_v2  ;;  %v153_v6 = vld [vmem:[#allocation7 + $0x8] sm:$0xff]  ;;  %v154_v9 = vld [vmem:[#allocation7 + $0x10] sm:$0xff]  ;;  %vm163_vm5 = vcmask 261120  }
  0x3a   :  { %v319_v7 = vpack.c.bf16 %v153_v6, %v152_v5  ;;  %v63_v8 = vld [vmem:[#allocation2] sm:$0xff]  ;;  %v155_v10 = vld [vmem:[#allocation7 + $0x18] sm:$0xff]  ;;  %v239_v18 = vand.u32 127, %v238_v17 }
  0x3b   :  { %317 = vmatpush3.bf16.msk.msra.mxu0 %vm316_vm3, %v315_v4  ;;  %v322_v11 = vpack.c.bf16 %v155_v10, %v154_v9  ;;  %v283_v12 = vld [vmem:[%s577_s2] ss:$0 sm:$0xff]  ;;  %s466_s2 = smov [#allocation9]  }
  0x3c   :  { %320 = vmatpush3.bf16.msra.mxu1 %v319_v7  ;;  %v286_v19 = vld [vmem:[%s579_s4] ss:$0 sm:$0xff]  ;;  %vm240_vm6 = vcmp.lt.s32.totalorder %v239_v18, 3  ;;  %s269_s12 = sshll.u32 %s466_s2, 4  ;;  %s270_s12 = int_to_ptr.vmem [resolvable:$true] %s269_s12 }
  0x3d   :  { %321 = vmatprep.subr.bf16.mxu1 %v462_v0  ;;  %s405_s13 = scalar_lea.vmem %s270_s12, 128  ;;  %p410_p11 = scmp.lt.s32.totalorder %s270_s12, %s270_s12 }
  0x3e   :  { %301 = vmatmul.mubr.msk.f32.vlgmr.msra.gmra.mrb[0].mxu0 %vm73_vm4, %v63_v8  ;;  %p406_p10 = scmp.ne.s32.totalorder %s270_s12, %s405_s13  ;;  %p411_p12 = scmp.lt.s32.totalorder %s405_s13, %s405_s13 }
  0x40   :  { %323 = vmatpush3.bf16.msra.mxu1 %v322_v11  ;;  %p412_p13 = por %p411_p12, %p410_p11 }
  0x42   :  { %p413_p0 = pnand %p412_p13, %p406_p10 }
 0x111   :  { %v147_v13 = vpop.f32.mrb[0].mxu0 }
 0x112   :  { %v148_v14 = vadd.f32 %v283_v12, %v147_v13  ;;  %v302_v15 = vpop.f32.mrb[1].mxu0 }
 0x114   :  { %v151_v16 = vmax.f32 %v148_v14, 0.0 }
 0x116   :  { %312 = vmatmul.mubr.msk.f32.vlgmr.msra.gmra.mrb[0].mxu1 %vm163_vm5, %v151_v16 }
 0x1e9   :  { %v233_v20 = vpop.f32.mrb[0].mxu1 }
 0x1ea   :  { %v234_v21 = vadd.f32 %v286_v19, %v233_v20  ;;  %v313_v22 = vpop.f32.mrb[1].mxu1 }
 0x1ec   :  { %237 = vst [vmem:[#allocation9] sm:$0xff] %v234_v21  ;;  %v241_v23 = vsel %vm240_vm6, %v234_v21, -inf }
 0x1ed   :  { %242 = vmax.xlane.f32.xlu0 %v241_v23 }
 0x27a   :  { %v243_v24 = vpop.xlane.xlu0 %242 }
 0x27b   :  { %v244_v25 = vsub.f32 %v241_v23, %v243_v24 }
 0x27d   :  { %v245_v26 = vmul.f32 1.442695, %v244_v25 }
 0x27f   :  { %335 = vpow2.f32 %v245_v26 }
 0x289   :  { %v336_v27 = vpop.eup %335 }
 0x28a   :  { %v247_v28 = vsel %vm240_vm6, %v336_v27, 0.0 }
 0x28b   :  { %248 = vadd.xlane.f32.xlu0 %v247_v28 }
 0x28c   :  { %416 = shalt.err (!%p413_p0)
}
 0x28d   :  { %s417_s15 = scalar_lea.hbm %s581_s6, 128 }
 0x28e   :  { %p418_p1 = scmp.ne.s32.totalorder %s581_s6, %s417_s15  ;;  %p421_p2 = scmp.lt.u32.totalorder %s417_s15, %s581_s6 }
 0x290   :  { %p423_p3 = pnand %p421_p2, %p418_p1 }
 0x292   :  { %426 = shalt.err (!%p423_p3)
}
 0x293   :  { %272 = dma.vmem_to_hbm [thread:$0]  %s270_s12, 128, %s581_s6, [#allocation10]  }
 0x294   :  { %s467_s1 = smov [#allocation8]  }
 0x295   :  { %s259_s22 = sshll.u32 %s467_s1, 4  ;;  %s260_s22 = int_to_ptr.vmem [resolvable:$true] %s259_s22 }
 0x296   :  { %s427_s23 = scalar_lea.vmem %s260_s22, 128  ;;  %p432_p5 = scmp.lt.s32.totalorder %s260_s22, %s260_s22 }
 0x297   :  { %p428_p4 = scmp.ne.s32.totalorder %s260_s22, %s427_s23  ;;  %p433_p6 = scmp.lt.s32.totalorder %s427_s23, %s427_s23 }
 0x299   :  { %p434_p7 = por %p433_p6, %p432_p5 }
 0x29b   :  { %p435_p8 = pnand %p434_p7, %p428_p4 }
 0x318   :  { %v249_v29 = vpop.xlane.xlu0 %248 }
 0x319   :  { %337 = vrcp.f32 %v249_v29 }
 0x323   :  { %v338_v30 = vpop.eup %337 }
 0x324   :  { %v251_v31 = vmul.f32 %v338_v30, %v247_v28 }
 0x326   :  { %252 = vst [vmem:[#allocation8] sm:$0xff] %v251_v31 }
 0x327   :  { %438 = shalt.err (!%p435_p8)
}
 0x328   :  { %s439_s26 = scalar_lea.hbm %s580_s5, 128 }
 0x329   :  { %p440_p9 = scmp.ne.s32.totalorder %s580_s5, %s439_s26  ;;  %p443_p10 = scmp.lt.u32.totalorder %s439_s26, %s580_s5 }
 0x32b   :  { %p445_p11 = pnand %p443_p10, %p440_p9 }
 0x32d   :  { %448 = shalt.err (!%p445_p11)
}
 0x32e   :  { %262 = dma.vmem_to_hbm [thread:$0]  %s260_s22, 128, %s580_s5, [#allocation4]  }
 0x32f   :  { %453 = dma.done.wait [#allocation4], 128  }
 0x330   :  { %454 = vsyncadd [#allocation4], 4294967168 }
 0x331   :  { %455 = dma.done.wait [#allocation10], 128  }
 0x332   :  { %456 = vsyncadd [#allocation10], 4294967168 }
 0x333   :  { %279 = vsyncpa [#allocation3], 1 }
 0x334   :  { %280 = vsyncpa [#allocation6], 1 }
 0x335   :  { %281 = vsyncpa [#allocation4], 1 }
 0x336   :  { %282 = vsyncpa [#allocation10], 1 }

</bundles_post_ra>
